<compile_context>
chip_gen: v7x
topology: tpu7x:2x2x1
jax: 0.10.0
libtpu: 0.0.40
codegen_flags: <defaults>
</compile_context>

<pallas_src>
import functools

import jax
import jax.numpy as jnp
from jax import lax
from jax.experimental import pallas as pl
from jax.experimental.pallas import tpu as pltpu

LANE = 128


def _round_up(a, b):
    return -(-a // b) * b


def _dice_kernel(x_ref, t_ref, inter_out, isum_out, tsum_out,
                 inter_acc, isum_acc, tsum_acc, *,
                 num_classes, rows, r_blk, r_chunk, s_per_split, needs_mask):
    # x_ref:  (1, C, r_blk, 128) logits tile (native dtype)
    # t_ref:  (1, 1, r_blk, 128) labels tile (int8/uint8/int32)
    # *_out:  (1, 1, C, 128) f32 per-(batch, split) partial sums
    # *_acc:  (C, 128) f32 VMEM scratch accumulators
    C = num_classes
    split = pl.program_id(1)
    s = pl.program_id(2)
    n_s = pl.num_programs(2)
    n_chunks = r_blk // r_chunk

    @pl.when(s == 0)
    def _():
        inter_acc[...] = jnp.zeros_like(inter_acc)
        isum_acc[...] = jnp.zeros_like(isum_acc)
        tsum_acc[...] = jnp.zeros_like(tsum_acc)

    # Global spatial-block index (unclamped).  The index_map clamps the DMA to
    # the last real block; re-read / out-of-range rows are zeroed by the mask.
    g = split * s_per_split + s

    # Upcast the label tile once (narrow labels travel the DMA as int8/uint8).
    labels_blk = t_ref[0, 0].astype(jnp.int32)                    # (r_blk, 128)

    def process(i):
        if n_chunks > 1:
            r0 = pl.multiple_of(i * r_chunk, 8)
            labels = lax.dynamic_slice_in_dim(labels_blk, r0, r_chunk, 0)
        else:
            r0 = 0
            labels = labels_blk
        x = x_ref[0, :, pl.ds(r0, r_chunk), :].astype(jnp.float32)  # (C, rc, 128)

        # Channel softmax: per-pixel across C lane-dense planes (VPU + EUP).
        m = jnp.max(x, axis=0, keepdims=True)
        e = jnp.exp(x - m)
        z = jnp.sum(e, axis=0, keepdims=True)
        p = e * pl.reciprocal(z, approx=True)                     # EUP reciprocal

        if needs_mask:
            # Rows past the real array (block tail or clamped re-read block).
            row0 = g * r_blk + i * r_chunk
            nvalid = jnp.clip(rows - row0, 0, r_chunk)
            ridx = lax.broadcasted_iota(jnp.int32, (r_chunk, LANE), 0)
            valid = ridx < nvalid
            labels = jnp.where(valid, labels, C)                  # out-of-range class
            p = jnp.where(valid[None], p, 0.0)

        # One-hot as a boolean compare (no float one-hot materialized).
        cidx = lax.broadcasted_iota(jnp.int32, (C, r_chunk, LANE), 0)
        onehot = cidx == labels[None]

        inter_acc[...] += jnp.sum(jnp.where(onehot, p, 0.0), axis=1)   # (C, 128)
        isum_acc[...] += jnp.sum(p, axis=1)                            # (C, 128)
        tsum_acc[...] += jnp.sum(jnp.where(onehot, 1.0, 0.0), axis=1)  # (C, 128)

    if n_chunks == 1:
        process(0)
    else:
        pl.loop(0, n_chunks)(process)

    @pl.when(s == n_s - 1)
    def _():
        inter_out[...] = inter_acc[...][None, None]
        isum_out[...] = isum_acc[...][None, None]
        tsum_out[...] = tsum_acc[...][None, None]


def _dice_loss_impl(logits, target, smooth=1.0, reduce="mean",
                    block_rows=None, chunk_rows=None):
    """logits: (N, C, H, W) float; target: (N, H, W) integer labels."""
    if reduce not in ("mean", "sum"):
        raise ValueError(f"unsupported reduce={reduce}")
    N, C, H, W = logits.shape
    S = H * W
    if logits.dtype == jnp.float64:
        logits = logits.astype(jnp.float32)
    itemsize = jnp.dtype(logits.dtype).itemsize
    row_align = 8 * max(1, 4 // itemsize)          # 8 rows f32, 16 rows bf16/f16

    rows = -(-S // LANE)
    lane_pad = rows * LANE - S

    # ---- tile sizing -------------------------------------------------------
    # In-kernel f32 working-set chunk (~1 MiB per (C, r_chunk, 128) f32 stack).
    chunk_budget = 1 << 20
    r_chunk_def = max(32, min(1024, (chunk_budget // (C * LANE * 4)) // 32 * 32))
    # DMA tile: ~6 MiB of logits per block, a multiple of the chunk size.
    tile_budget = 6 << 20
    r_cap = max(r_chunk_def,
                (tile_budget // (C * LANE * itemsize)) // r_chunk_def * r_chunk_def)

    if rows < row_align:
        r_blk = rows                                # tiny: single exact block
    else:
        want = block_rows if block_rows is not None else min(
            r_cap, _round_up(rows, row_align))
        r_blk = max(row_align, _round_up(int(want), row_align))

    if chunk_rows is not None:
        r_chunk = int(chunk_rows)
    else:
        r_chunk = min(r_chunk_def, r_blk)
    if (r_chunk <= 0 or r_blk % r_chunk != 0
            or (r_chunk != r_blk and r_chunk % row_align != 0)):
        r_chunk = r_blk                             # single-chunk fallback

    num_blocks = -(-rows // r_blk)
    # Keep both v7x TensorCores busy when the batch axis alone cannot.
    n_split = 2 if (N == 1 and num_blocks >= 2) else 1
    s_per_split = -(-num_blocks // n_split)
    needs_mask = (n_split * s_per_split * r_blk) != rows

    # ---- operands (native dtypes; only a lane-tail pad, no block pad) ------
    x = logits.reshape(N, C, S)
    t = target.reshape(N, 1, S)
    if t.dtype not in (jnp.int8, jnp.uint8, jnp.int32):
        t = t.astype(jnp.int32)
    if lane_pad:
        # Narrow labels only when a copy happens anyway and tiles stay aligned.
        if C <= 127 and t.dtype == jnp.int32 and (r_blk % 32 == 0 or r_blk == rows):
            t = t.astype(jnp.int8)
        x = jnp.pad(x, ((0, 0), (0, 0), (0, lane_pad)))
        t = jnp.pad(t, ((0, 0), (0, 0), (0, lane_pad)), constant_values=C)
    x = x.reshape(N, C, rows, LANE)
    t = t.reshape(N, 1, rows, LANE)

    kernel = functools.partial(
        _dice_kernel, num_classes=C, rows=rows, r_blk=r_blk, r_chunk=r_chunk,
        s_per_split=s_per_split, needs_mask=needs_mask)

    def in_map(n, c, s):
        return (n, 0, jnp.minimum(c * s_per_split + s, num_blocks - 1), 0)

    def out_map(n, c, s):
        return (n, c, 0, 0)

    out_sds = jax.ShapeDtypeStruct((N, n_split, C, LANE), jnp.float32)
    inter, isum, tsum = pl.pallas_call(
        kernel,
        out_shape=(out_sds, out_sds, out_sds),
        grid=(N, n_split, s_per_split),
        in_specs=[
            pl.BlockSpec((1, C, r_blk, LANE), in_map),
            pl.BlockSpec((1, 1, r_blk, LANE), in_map),
        ],
        out_specs=(
            pl.BlockSpec((1, 1, C, LANE), out_map),
            pl.BlockSpec((1, 1, C, LANE), out_map),
            pl.BlockSpec((1, 1, C, LANE), out_map),
        ),
        scratch_shapes=[pltpu.VMEM((C, LANE), jnp.float32) for _ in range(3)],
        compiler_params=pltpu.CompilerParams(
            dimension_semantics=("parallel", "parallel", "arbitrary"),
            vmem_limit_bytes=48 * 1024 * 1024),
    )(x, t)

    # Tiny (N, n_split, C, 128) partials -> dice in plain XLA.
    inter = inter.sum(axis=(1, 3))                  # (N, C)
    isum = isum.sum(axis=(1, 3))
    tsum = tsum.sum(axis=(1, 3))
    if lane_pad:
        # Zero-padded logits contribute exactly 1/C per padded pixel to isum
        # (and nothing to inter/tsum since their label is the class C).
        isum = isum - (lane_pad / C)
    dice = (2.0 * inter + smooth) / (isum + tsum + smooth)
    if reduce == "mean":
        return jnp.mean(C * 1.0 - dice.sum(axis=1))
    return N - jnp.sum(dice)


dice_loss = jax.jit(
    _dice_loss_impl,
    static_argnames=("smooth", "reduce", "block_rows", "chunk_rows"))


def _dice_loss_ref(logits, target, smooth=1.0, reduce="mean"):
    """Pure-JAX reference mirroring the PyTorch forward."""
    N, C, H, W = logits.shape
    p = jax.nn.softmax(logits.astype(jnp.float32), axis=1)
    onehot = jax.nn.one_hot(target, C, axis=1, dtype=jnp.float32)
    iflat = p.reshape(N, C, -1)
    tflat = onehot.reshape(N, C, -1)
    inter = (iflat * tflat).sum(axis=2)
    dice = (2.0 * inter + smooth) / (iflat.sum(axis=2) + tflat.sum(axis=2) + smooth)
    if reduce == "mean":
        return (C * 1.0 - dice.sum(axis=1)).mean()
    return N - dice.sum()


if __name__ == "__main__":
    key = jax.random.PRNGKey(0)
    ks = jax.random.split(key, 10)
    tol = dict(rtol=2e-3, atol=2e-3)   # approx reciprocal on the EUP

    # 1) S multiple of 128, tiny single block; 'mean' and 'sum'.
    N, C, H, W = 2, 4, 16, 16
    logits = jax.random.normal(ks[0], (N, C, H, W), dtype=jnp.float32)
    target = jax.random.randint(ks[1], (N, H, W), 0, C, dtype=jnp.int32)
    out = jax.block_until_ready(dice_loss(logits, target, smooth=1.0, reduce="mean"))
    ref = _dice_loss_ref(logits, target, smooth=1.0, reduce="mean")
    assert jnp.allclose(out, ref, **tol), (out, ref)
    out_s = jax.block_until_ready(dice_loss(logits, target, smooth=1.0, reduce="sum"))
    ref_s = _dice_loss_ref(logits, target, smooth=1.0, reduce="sum")
    assert jnp.allclose(out_s, ref_s, **tol), (out_s, ref_s)

    # 2) S not a multiple of 128: lane pad, int8 labels, analytic isum fixup.
    N2, C2, H2, W2 = 2, 5, 10, 10
    logits2 = jax.random.normal(ks[2], (N2, C2, H2, W2), dtype=jnp.float32)
    target2 = jax.random.randint(ks[3], (N2, H2, W2), 0, C2, dtype=jnp.int32)
    out2 = jax.block_until_ready(dice_loss(logits2, target2))
    ref2 = _dice_loss_ref(logits2, target2)
    assert jnp.allclose(out2, ref2, **tol), (out2, ref2)

    # 3) Multi-block spatial reduction + in-kernel chunk loop + row-tail mask.
    N3, C3, H3, W3 = 2, 3, 48, 48
    logits3 = jax.random.normal(ks[4], (N3, C3, H3, W3), dtype=jnp.float32)
    target3 = jax.random.randint(ks[5], (N3, H3, W3), 0, C3, dtype=jnp.int32)
    out3 = jax.block_until_ready(dice_loss(logits3, target3, block_rows=16, chunk_rows=8))
    ref3 = _dice_loss_ref(logits3, target3)
    assert jnp.allclose(out3, ref3, **tol), (out3, ref3)

    # 4) N=1 bf16: 2-way spatial split (v7x dual-core path), native-dtype DMA.
    N4, C4, H4, W4 = 1, 4, 64, 64
    logits4 = jax.random.normal(ks[6], (N4, C4, H4, W4), jnp.float32).astype(jnp.bfloat16)
    target4 = jax.random.randint(ks[7], (N4, H4, W4), 0, C4, dtype=jnp.int32)
    out4 = jax.block_until_ready(dice_loss(logits4, target4, block_rows=8))
    ref4 = _dice_loss_ref(logits4, target4)
    assert jnp.allclose(out4, ref4, **tol), (out4, ref4)

    # 5) N=1 with split AND a clamped/masked out-of-range spatial block.
    N5, C5, H5, W5 = 1, 3, 48, 48
    logits5 = jax.random.normal(ks[8], (N5, C5, H5, W5), dtype=jnp.float32)
    target5 = jax.random.randint(ks[9], (N5, H5, W5), 0, C5, dtype=jnp.int32)
    out5 = jax.block_until_ready(dice_loss(logits5, target5, block_rows=8))
    ref5 = _dice_loss_ref(logits5, target5)
    assert jnp.allclose(out5, ref5, **tol), (out5, ref5)

    # 6) Default block-size heuristic path (no overrides), rows >= 8.
    N6, C6, H6, W6 = 2, 4, 64, 64
    logits6 = jax.random.normal(ks[0], (N6, C6, H6, W6), dtype=jnp.float32)
    target6 = jax.random.randint(ks[1], (N6, H6, W6), 0, C6, dtype=jnp.int32)
    out6 = jax.block_until_ready(dice_loss(logits6, target6))
    ref6 = _dice_loss_ref(logits6, target6)
    assert jnp.allclose(out6, ref6, **tol), (out6, ref6)

    print("KERNEL_OK")
</pallas_src>

<mosaic_0001>
module attributes {stable_mosaic.version = 11 : i64} {
  func.func @_dice_kernel(%arg0: i32, %arg1: i32, %arg2: i32, %arg3: memref<1x4x2x128xf32, #tpu.memory_space<vmem>>, %arg4: memref<1x1x2x128xi32, #tpu.memory_space<vmem>>, %arg5: memref<1x1x4x128xf32, #tpu.memory_space<vmem>>, %arg6: memref<1x1x4x128xf32, #tpu.memory_space<vmem>>, %arg7: memref<1x1x4x128xf32, #tpu.memory_space<vmem>>, %arg8: memref<4x128xf32, #tpu.memory_space<vmem>>, %arg9: memref<4x128xf32, #tpu.memory_space<vmem>>, %arg10: memref<4x128xf32, #tpu.memory_space<vmem>>) attributes {dimension_semantics = [#tpu.dimension_semantics<parallel>, #tpu.dimension_semantics<parallel>, #tpu.dimension_semantics<arbitrary>], iteration_bounds = array<i64: 2, 1, 1>, scalar_prefetch = 0 : i64, scratch_operands = 3 : i64, tpu.core_type = #tpu.core_type<tc>, window_params = [{transform_indices = @transform_0, window_bounds = array<i64: 1, 4, 2, 128>}, {transform_indices = @transform_1, window_bounds = array<i64: 1, 1, 2, 128>}, {transform_indices = @transform_2, window_bounds = array<i64: 1, 1, 4, 128>}, {transform_indices = @transform_3, window_bounds = array<i64: 1, 1, 4, 128>}, {transform_indices = @transform_4, window_bounds = array<i64: 1, 1, 4, 128>}]} {
    %c0_i32 = arith.constant 0 : i32
    %0 = arith.cmpi eq, %arg2, %c0_i32 : i32
    %1 = arith.extui %0 : i1 to i32
    %c0_i32_0 = arith.constant 0 : i32
    %2 = arith.cmpi ne, %1, %c0_i32_0 : i32
    scf.if %2 {
      %cst_29 = arith.constant 0.000000e+00 : f32
      %41 = vector.broadcast %cst_29 : f32 to vector<4x128xf32>
      %c0_30 = arith.constant 0 : index
      %c0_31 = arith.constant 0 : index
      %42 = vector.load %arg8[%c0_30, %c0_31] : memref<4x128xf32, #tpu.memory_space<vmem>>, vector<4x128xf32>
      tpu.vector_store %arg8[%c0_30, %c0_31], %41 {strides = array<i32>} : memref<4x128xf32, #tpu.memory_space<vmem>>, vector<4x128xf32>,
      %cst_32 = arith.constant 0.000000e+00 : f32
      %43 = vector.broadcast %cst_32 : f32 to vector<4x128xf32>
      %c0_33 = arith.constant 0 : index
      %c0_34 = arith.constant 0 : index
      %44 = vector.load %arg9[%c0_33, %c0_34] : memref<4x128xf32, #tpu.memory_space<vmem>>, vector<4x128xf32>
      tpu.vector_store %arg9[%c0_33, %c0_34], %43 {strides = array<i32>} : memref<4x128xf32, #tpu.memory_space<vmem>>, vector<4x128xf32>,
      %cst_35 = arith.constant 0.000000e+00 : f32
      %45 = vector.broadcast %cst_35 : f32 to vector<4x128xf32>
      %c0_36 = arith.constant 0 : index
      %c0_37 = arith.constant 0 : index
      %46 = vector.load %arg10[%c0_36, %c0_37] : memref<4x128xf32, #tpu.memory_space<vmem>>, vector<4x128xf32>
      tpu.vector_store %arg10[%c0_36, %c0_37], %45 {strides = array<i32>} : memref<4x128xf32, #tpu.memory_space<vmem>>, vector<4x128xf32>,
    } else {
    }
    %c0 = arith.constant 0 : index
    %c0_1 = arith.constant 0 : index
    %c0_2 = arith.constant 0 : index
    %c0_3 = arith.constant 0 : index
    %3 = vector.load %arg4[%c0, %c0_1, %c0_2, %c0_3] : memref<1x1x2x128xi32, #tpu.memory_space<vmem>>, vector<1x1x2x128xi32>
    %4 = vector.shape_cast %3 : vector<1x1x2x128xi32> to vector<2x128xi32>
    %c0_4 = arith.constant 0 : index
    %c0_5 = arith.constant 0 : index
    %c0_6 = arith.constant 0 : index
    %c0_7 = arith.constant 0 : index
    %5 = vector.load %arg3[%c0_4, %c0_5, %c0_6, %c0_7] : memref<1x4x2x128xf32, #tpu.memory_space<vmem>>, vector<1x4x2x128xf32>
    %6 = vector.shape_cast %5 : vector<1x4x2x128xf32> to vector<4x2x128xf32>
    %cst = arith.constant dense<0xFF800000> : vector<2x128xf32>
    %7 = vector.multi_reduction <maximumf>, %6, %cst [0] : vector<4x2x128xf32> to vector<2x128xf32>
    %8 = vector.shape_cast %7 : vector<2x128xf32> to vector<1x2x128xf32>
    %9 = vector.broadcast %8 : vector<1x2x128xf32> to vector<4x2x128xf32>
    %10 = arith.subf %6, %9 : vector<4x2x128xf32>
    %11 = math.exp %10 : vector<4x2x128xf32>
    %cst_8 = arith.constant dense<0.000000e+00> : vector<2x128xf32>
    %12 = vector.multi_reduction <add>, %11, %cst_8 [0] : vector<4x2x128xf32> to vector<2x128xf32>
    %13 = vector.shape_cast %12 : vector<2x128xf32> to vector<1x2x128xf32>
    %14 = tpu.reciprocal %13 {approx = true} : vector<1x2x128xf32> -> vector<1x2x128xf32>
    %15 = vector.broadcast %14 : vector<1x2x128xf32> to vector<4x2x128xf32>
    %16 = arith.mulf %11, %15 : vector<4x2x128xf32>
    %17 = tpu.iota {dimensions = array<i32: 0>} : vector<4x2x128xi32>
    %18 = vector.shape_cast %4 : vector<2x128xi32> to vector<1x2x128xi32>
    %19 = vector.broadcast %18 : vector<1x2x128xi32> to vector<4x2x128xi32>
    %20 = arith.cmpi eq, %17, %19 : vector<4x2x128xi32>
    %c0_9 = arith.constant 0 : index
    %c0_10 = arith.constant 0 : index
    %21 = vector.load %arg8[%c0_9, %c0_10] : memref<4x128xf32, #tpu.memory_space<vmem>>, vector<4x128xf32>
    %cst_11 = arith.constant 0.000000e+00 : f32
    %22 = vector.broadcast %cst_11 : f32 to vector<4x2x128xf32>
    %23 = arith.select %20, %16, %22 : vector<4x2x128xi1>, vector<4x2x128xf32>
    %cst_12 = arith.constant dense<0.000000e+00> : vector<4x128xf32>
    %24 = vector.multi_reduction <add>, %23, %cst_12 [1] : vector<4x2x128xf32> to vector<4x128xf32>
    %25 = arith.addf %21, %24 : vector<4x128xf32>
    %c0_13 = arith.constant 0 : index
    %c0_14 = arith.constant 0 : index
    %26 = vector.load %arg8[%c0_13, %c0_14] : memref<4x128xf32, #tpu.memory_space<vmem>>, vector<4x128xf32>
    tpu.vector_store %arg8[%c0_13, %c0_14], %25 {strides = array<i32>} : memref<4x128xf32, #tpu.memory_space<vmem>>, vector<4x128xf32>,
    %c0_15 = arith.constant 0 : index
    %c0_16 = arith.constant 0 : index
    %27 = vector.load %arg9[%c0_15, %c0_16] : memref<4x128xf32, #tpu.memory_space<vmem>>, vector<4x128xf32>
    %cst_17 = arith.constant dense<0.000000e+00> : vector<4x128xf32>
    %28 = vector.multi_reduction <add>, %16, %cst_17 [1] : vector<4x2x128xf32> to vector<4x128xf32>
    %29 = arith.addf %27, %28 : vector<4x128xf32>
    %c0_18 = arith.constant 0 : index
    %c0_19 = arith.constant 0 : index
    %30 = vector.load %arg9[%c0_18, %c0_19] : memref<4x128xf32, #tpu.memory_space<vmem>>, vector<4x128xf32>
    tpu.vector_store %arg9[%c0_18, %c0_19], %29 {strides = array<i32>} : memref<4x128xf32, #tpu.memory_space<vmem>>, vector<4x128xf32>,
    %c0_20 = arith.constant 0 : index
    %c0_21 = arith.constant 0 : index
    %31 = vector.load %arg10[%c0_20, %c0_21] : memref<4x128xf32, #tpu.memory_space<vmem>>, vector<4x128xf32>
    %cst_22 = arith.constant 1.000000e+00 : f32
    %cst_23 = arith.constant 0.000000e+00 : f32
    %32 = vector.broadcast %cst_22 : f32 to vector<4x2x128xf32>
    %33 = vector.broadcast %cst_23 : f32 to vector<4x2x128xf32>
    %34 = arith.select %20, %32, %33 : vector<4x2x128xi1>, vector<4x2x128xf32>
    %cst_24 = arith.constant dense<0.000000e+00> : vector<4x128xf32>
    %35 = vector.multi_reduction <add>, %34, %cst_24 [1] : vector<4x2x128xf32> to vector<4x128xf32>
    %36 = arith.addf %31, %35 : vector<4x128xf32>
    %c0_25 = arith.constant 0 : index
    %c0_26 = arith.constant 0 : index
    %37 = vector.load %arg10[%c0_25, %c0_26] : memref<4x128xf32, #tpu.memory_space<vmem>>, vector<4x128xf32>
    tpu.vector_store %arg10[%c0_25, %c0_26], %36 {strides = array<i32>} : memref<4x128xf32, #tpu.memory_space<vmem>>, vector<4x128xf32>,
    %c0_i32_27 = arith.constant 0 : i32
    %38 = arith.cmpi eq, %arg2, %c0_i32_27 : i32
    %39 = arith.extui %38 : i1 to i32
    %c0_i32_28 = arith.constant 0 : i32
    %40 = arith.cmpi ne, %39, %c0_i32_28 : i32
    scf.if %40 {
      %c0_29 = arith.constant 0 : index
      %c0_30 = arith.constant 0 : index
      %41 = vector.load %arg8[%c0_29, %c0_30] : memref<4x128xf32, #tpu.memory_space<vmem>>, vector<4x128xf32>
      %42 = vector.shape_cast %41 : vector<4x128xf32> to vector<1x1x4x128xf32>
      %c0_31 = arith.constant 0 : index
      %c0_32 = arith.constant 0 : index
      %c0_33 = arith.constant 0 : index
      %c0_34 = arith.constant 0 : index
      %43 = vector.load %arg5[%c0_31, %c0_32, %c0_33, %c0_34] : memref<1x1x4x128xf32, #tpu.memory_space<vmem>>, vector<1x1x4x128xf32>
      tpu.vector_store %arg5[%c0_31, %c0_32, %c0_33, %c0_34], %42 {strides = array<i32>} : memref<1x1x4x128xf32, #tpu.memory_space<vmem>>, vector<1x1x4x128xf32>,
      %c0_35 = arith.constant 0 : index
      %c0_36 = arith.constant 0 : index
      %44 = vector.load %arg9[%c0_35, %c0_36] : memref<4x128xf32, #tpu.memory_space<vmem>>, vector<4x128xf32>
      %45 = vector.shape_cast %44 : vector<4x128xf32> to vector<1x1x4x128xf32>
      %c0_37 = arith.constant 0 : index
      %c0_38 = arith.constant 0 : index
      %c0_39 = arith.constant 0 : index
      %c0_40 = arith.constant 0 : index
      %46 = vector.load %arg6[%c0_37, %c0_38, %c0_39, %c0_40] : memref<1x1x4x128xf32, #tpu.memory_space<vmem>>, vector<1x1x4x128xf32>
      tpu.vector_store %arg6[%c0_37, %c0_38, %c0_39, %c0_40], %45 {strides = array<i32>} : memref<1x1x4x128xf32, #tpu.memory_space<vmem>>, vector<1x1x4x128xf32>,
      %c0_41 = arith.constant 0 : index
      %c0_42 = arith.constant 0 : index
      %47 = vector.load %arg10[%c0_41, %c0_42] : memref<4x128xf32, #tpu.memory_space<vmem>>, vector<4x128xf32>
      %48 = vector.shape_cast %47 : vector<4x128xf32> to vector<1x1x4x128xf32>
      %c0_43 = arith.constant 0 : index
      %c0_44 = arith.constant 0 : index
      %c0_45 = arith.constant 0 : index
      %c0_46 = arith.constant 0 : index
      %49 = vector.load %arg7[%c0_43, %c0_44, %c0_45, %c0_46] : memref<1x1x4x128xf32, #tpu.memory_space<vmem>>, vector<1x1x4x128xf32>
      tpu.vector_store %arg7[%c0_43, %c0_44, %c0_45, %c0_46], %48 {strides = array<i32>} : memref<1x1x4x128xf32, #tpu.memory_space<vmem>>, vector<1x1x4x128xf32>,
    } else {
    }
    return
  }
  func.func @transform_0(%arg0: i32, %arg1: i32, %arg2: i32) -> (i32, i32, i32, i32) {
    %c1_i32 = arith.constant 1 : i32
    %0 = arith.muli %arg1, %c1_i32 : i32
    %1 = arith.addi %0, %arg2 : i32
    %c0_i32 = arith.constant 0 : i32
    %2 = arith.minsi %1, %c0_i32 : i32
    %c0_i32_0 = arith.constant 0 : i32
    %c0_i32_1 = arith.constant 0 : i32
    %c0_i32_2 = arith.constant 0 : i32
    return %arg0, %c0_i32_0, %2, %c0_i32_1 : i32, i32, i32, i32
  }
  func.func @transform_1(%arg0: i32, %arg1: i32, %arg2: i32) -> (i32, i32, i32, i32) {
    %c1_i32 = arith.constant 1 : i32
    %0 = arith.muli %arg1, %c1_i32 : i32
    %1 = arith.addi %0, %arg2 : i32
    %c0_i32 = arith.constant 0 : i32
    %2 = arith.minsi %1, %c0_i32 : i32
    %c0_i32_0 = arith.constant 0 : i32
    %c0_i32_1 = arith.constant 0 : i32
    %c0_i32_2 = arith.constant 0 : i32
    return %arg0, %c0_i32_0, %2, %c0_i32_1 : i32, i32, i32, i32
  }
  func.func @transform_2(%arg0: i32, %arg1: i32, %arg2: i32) -> (i32, i32, i32, i32) {
    %c0_i32 = arith.constant 0 : i32
    %c0_i32_0 = arith.constant 0 : i32
    %c0_i32_1 = arith.constant 0 : i32
    return %arg0, %arg1, %c0_i32, %c0_i32_0 : i32, i32, i32, i32
  }
  func.func @transform_3(%arg0: i32, %arg1: i32, %arg2: i32) -> (i32, i32, i32, i32) {
    %c0_i32 = arith.constant 0 : i32
    %c0_i32_0 = arith.constant 0 : i32
    %c0_i32_1 = arith.constant 0 : i32
    return %arg0, %arg1, %c0_i32, %c0_i32_0 : i32, i32, i32, i32
  }
  func.func @transform_4(%arg0: i32, %arg1: i32, %arg2: i32) -> (i32, i32, i32, i32) {
    %c0_i32 = arith.constant 0 : i32
    %c0_i32_0 = arith.constant 0 : i32
    %c0_i32_1 = arith.constant 0 : i32
    return %arg0, %arg1, %c0_i32, %c0_i32_0 : i32, i32, i32, i32
  }
}

</mosaic_0001>

<bundles_post_ra>
// kernel: _dice_loss_impl.1
= control target key start
LH: loop header
LB: loop body
LE: loop exit
PB: predicated region body
PF: predicated region fallthrough
CT: control target
= control target key end

     0   :  { %s802_s15 = smov 0   ;;  %s804_s16 = smov 0   ;;  %s905_s0 = inlined_call_operand.vmem [shape: f32[2,4,2,128], index: 0, kind: input, shape index: {}]   ;;  %s906_s1 = inlined_call_operand.vmem [shape: s32[2,1,2,128], index: 1, kind: input, shape index: {}]   ;;  %s907_s2 = inlined_call_operand.vmem [shape: f32[2,1,4,128], index: 2, kind: output, shape index: {0}]   ;;  %s908_s3 = inlined_call_operand.vmem [shape: f32[2,1,4,128], index: 3, kind: output, shape index: {1}]   ;;  %s909_s4 = inlined_call_operand.vmem [shape: f32[2,1,4,128], index: 4, kind: output, shape index: {2}]  }
   0x1   :  { %s806_s17 = smov 0  }
   0x2 LB: > { %s34_s18 = sadd.s32 1, %s770_s16  ;;  %p707_p0 = scmp.ge.s32.totalorder %s774_s17, 1  ;;  %s774_s17 = sphi %s806_s17, %s15_s17   ;;  %s770_s16 = sphi %s804_s16, %s911_s16   ;;  %s766_s15 = sphi %s802_s15, %s910_s15  }
   0x3   : > { %p36_p1 = scmp.ge.s32.totalorder %s34_s18, 2  ;;  %p235_p2 = scmp.lt.s32.totalorder %s774_s17, 3 }
   0x5   : > { %s913_s18 = smov (%p36_p1, %s34_s18), 0  ;;  %p236_p3 = pnand %p707_p0, %p235_p2 }
   0x6   : > { %p296_p4 = scmp.lt.s32.totalorder (!%p236_p3), %s766_s15, 1  ;;  %v776_v0 = vmov (!%p236_p3), 0.0   ;;  %vm353_vm0 = vcmask (!%p236_p3), 1041408   ;;  %vm426_vm5 = vcmask (!%p236_p3), 1041409   ;;  %vm428_vm6 = vcmask (!%p236_p3), 1042434  }
   0x7   : > { %239 = sbr.rel (%p236_p3) target bundleno = 91 (0x5b), region = 28  ;;  %345 = vst [vmem:[#allocation2] sm:$0xf] (!%p236_p3), %v776_v0  ;;  %346 = vst [vmem:[#allocation3] sm:$0xf] (!%p236_p3), %v776_v0  ;;  %vm430_vm7 = vcmask (!%p236_p3), 1043459  }
   0x8   : > { %347 = vst [vmem:[#allocation4] sm:$0xf] (!%p236_p3), %v776_v0 }
   0xe   : > { %s915_s15 = smov (!%p296_p4, %s766_s15), 1 }
   0xf   : > { %s716_s19 = sshll.u32 %s915_s15, 3  ;;  %s710_s20 = sshll.u32 %s915_s15, 1  ;;  %v474_v53 = vld [vmem:[#allocation4] sm:$0xf] }
  0x10   : > { %s303_s23 = scalar_lea.vmem %s905_s0, %s716_s19  ;;  %s316_s26 = scalar_lea.vmem %s906_s1, %s710_s20 }
  0x11   : > { %v830_v1 = vld [vmem:[%s316_s26] sm:$0x3]  ;;  %v350_v3 = vld [vmem:[%s303_s23 + $0x2] sm:$0x3]  ;;  %v351_v4 = vld [vmem:[%s303_s23 + $0x4] sm:$0x3] }
  0x12   : > { %v349_v2 = vld [vmem:[%s303_s23] sm:$0x3]  ;;  %v352_v5 = vld [vmem:[%s303_s23 + $0x6] sm:$0x3]  ;;  %v355_v7 = vsel %vm353_vm0, %v350_v3, -inf  ;;  %v356_v8 = vsel %vm353_vm0, %v351_v4, -inf }
  0x13   : > { %v354_v6 = vsel %vm353_vm0, %v349_v2, -inf  ;;  %v357_v9 = vsel %vm353_vm0, %v352_v5, -inf  ;;  %vm385_vm1 = vcmp.eq.s32.totalorder %v830_v1, 0  ;;  %vm386_vm2 = vcmp.eq.s32.totalorder %v830_v1, 1  ;;  %s860_s27 = sshll.u32 %s915_s15, 2 }
  0x14   : > { %v358_v10 = vmax.f32 %v354_v6, %v355_v7  ;;  %v359_v11 = vmax.f32 %v356_v8, %v357_v9  ;;  %vm387_vm3 = vcmp.eq.s32.totalorder %v830_v1, 2  ;;  %vm388_vm4 = vcmp.eq.s32.totalorder %v830_v1, 3  ;;  %s340_s30 = scalar_lea.vmem %s909_s4, %s860_s27  ;;  %s326_s7 = scalar_lea.vmem %s907_s2, %s860_s27 }
  0x15   : > { %v475_v12 = vsel %vm385_vm1, 1.0, %v776_v0  ;;  %v476_v13 = vsel %vm386_vm2, 1.0, %v776_v0  ;;  %v477_v14 = vsel %vm387_vm3, 1.0, %v776_v0  ;;  %v478_v15 = vsel %vm388_vm4, 1.0, %v776_v0  ;;  %s333_s10 = scalar_lea.vmem %s908_s3, %s860_s27 }
  0x16   : > { %v360_v16 = vmax.f32 %v358_v10, %v359_v11  ;;  %v479_v17 = vsel %vm353_vm0, %v475_v12, 0.0  ;;  %v486_v18 = vsel %vm353_vm0, %v476_v13, 0.0  ;;  %v493_v19 = vsel %vm353_vm0, %v477_v14, 0.0 }
  0x17   : > { %v480_v20 = vrot.slane %v479_v17, 4  ;;  %v487_v21 = vrot.slane %v486_v18, 4  ;;  %v494_v22 = vrot.slane %v493_v19, 4  ;;  %v500_v23 = vsel %vm353_vm0, %v478_v15, 0.0 }
  0x18   : > { %v361_v24 = vsub.f32 %v349_v2, %v360_v16  ;;  %v362_v25 = vsub.f32 %v350_v3, %v360_v16  ;;  %v363_v26 = vsub.f32 %v351_v4, %v360_v16  ;;  %v364_v27 = vsub.f32 %v352_v5, %v360_v16 }
  0x19   : > { %v481_v28 = vadd.f32 %v480_v20, %v479_v17  ;;  %v488_v29 = vadd.f32 %v487_v21, %v486_v18  ;;  %v495_v30 = vadd.f32 %v494_v22, %v493_v19  ;;  %v501_v31 = vrot.slane %v500_v23, 4 }
  0x1a   : > { %v365_v32 = vmul.f32 1.442695, %v361_v24  ;;  %v367_v33 = vmul.f32 1.442695, %v362_v25  ;;  %v369_v34 = vmul.f32 1.442695, %v363_v26 }
  0x1b   : > { %v371_v35 = vmul.f32 1.442695, %v364_v27  ;;  %v482_v36 = vrot.slane %v481_v28, 2  ;;  %v489_v37 = vrot.slane %v488_v29, 2  ;;  %v496_v38 = vrot.slane %v495_v30, 2 }
  0x1c   : > { %742 = vpow2.f32 %v365_v32  ;;  %v502_v39 = vadd.f32 %v501_v31, %v500_v23 }
  0x1d   : > { %744 = vpow2.f32 %v367_v33  ;;  %v483_v40 = vadd.f32 %v482_v36, %v481_v28  ;;  %v490_v41 = vadd.f32 %v489_v37, %v488_v29  ;;  %v497_v42 = vadd.f32 %v496_v38, %v495_v30 }
  0x1e   : > { %746 = vpow2.f32 %v369_v34  ;;  %v503_v43 = vrot.slane %v502_v39, 2 }
  0x1f   : > { %748 = vpow2.f32 %v371_v35  ;;  %v484_v44 = vrot.slane %v483_v40, 1  ;;  %v491_v45 = vrot.slane %v490_v41, 1  ;;  %v498_v46 = vrot.slane %v497_v42, 1 }
  0x20   : > { %v504_v47 = vadd.f32 %v503_v43, %v502_v39 }
  0x21   : > { %v485_v48 = vadd.f32 %v484_v44, %v483_v40  ;;  %v492_v49 = vadd.f32 %v491_v45, %v490_v41  ;;  %v499_v50 = vadd.f32 %v498_v46, %v497_v42 }
  0x22   : > { %v505_v51 = vrot.slane %v504_v47, 1 }
  0x23   : > { %v511_v52 = vsel %vm426_vm5, %v492_v49, %v485_v48 }
  0x24   : > { %v506_v54 = vadd.f32 %v505_v51, %v504_v47  ;;  %v512_v55 = vsel %vm428_vm6, %v499_v50, %v511_v52 }
  0x26   : > { %v743_v56 = vpop.eup %742  ;;  %v513_v57 = vsel %vm430_vm7, %v506_v54, %v512_v55 }
  0x27   : > { %v745_v58 = vpop.eup %744  ;;  %v373_v59 = vsel %vm353_vm0, %v743_v56, 0.0  ;;  %v515_v60 = vadd.f32 %v513_v57, %v474_v53 }
  0x28   : > { %v747_v61 = vpop.eup %746  ;;  %v374_v62 = vsel %vm353_vm0, %v745_v58, 0.0 }
  0x29   : > { %v749_v63 = vpop.eup %748  ;;  %v375_v0 = vadd.f32 %v374_v62, %v373_v59  ;;  %v376_v2 = vsel %vm353_vm0, %v747_v61, 0.0  ;;  %516 = vst [vmem:[#allocation4] sm:$0xf] %v515_v60 }
  0x2a   : > { %v378_v3 = vsel %vm353_vm0, %v749_v63, 0.0 }
  0x2b   : > { %v377_v4 = vadd.f32 %v376_v2, %v375_v0 }
  0x2d   : > { %v379_v5 = vadd.f32 %v378_v3, %v377_v4  ;;  %v389_v4 = vld [vmem:[#allocation2] sm:$0xf] }
  0x2f   : > { %750 = vrcp.f32 %v379_v5 }
  0x30   : > { %v524_v6 = vld [vmem:[#allocation4] sm:$0xf] }
  0x31   : > { %525 = vst [vmem:[%s340_s30] sm:$0xf] %v524_v6 }
  0x39   : > { %v751_v7 = vpop.eup %750 }
  0x3a   : > { %v381_v8 = vmul.f32 %v751_v7, %v743_v56  ;;  %v382_v9 = vmul.f32 %v751_v7, %v745_v58  ;;  %v383_v10 = vmul.f32 %v751_v7, %v747_v61  ;;  %v384_v11 = vmul.f32 %v751_v7, %v749_v63 }
  0x3c   : > { %v390_v12 = vsel %vm385_vm1, %v381_v8, 0.0  ;;  %v391_v13 = vsel %vm386_vm2, %v382_v9, 0.0  ;;  %v392_v14 = vsel %vm387_vm3, %v383_v10, 0.0  ;;  %v393_v15 = vsel %vm388_vm4, %v384_v11, 0.0 }
  0x3d   : > { %v394_v16 = vsel %vm353_vm0, %v390_v12, 0.0  ;;  %v401_v17 = vsel %vm353_vm0, %v391_v13, 0.0  ;;  %v408_v18 = vsel %vm353_vm0, %v392_v14, 0.0  ;;  %v415_v19 = vsel %vm353_vm0, %v393_v15, 0.0  ;;  %v435_v13 = vld [vmem:[#allocation3] sm:$0xf] }
  0x3e   : > { %v395_v20 = vrot.slane %v394_v16, 4  ;;  %v402_v21 = vrot.slane %v401_v17, 4  ;;  %v409_v22 = vrot.slane %v408_v18, 4  ;;  %v416_v23 = vrot.slane %v415_v19, 4 }
  0x3f   : > { %v436_v24 = vsel %vm353_vm0, %v381_v8, 0.0  ;;  %v443_v25 = vsel %vm353_vm0, %v382_v9, 0.0  ;;  %v450_v26 = vsel %vm353_vm0, %v383_v10, 0.0  ;;  %v457_v1 = vsel %vm353_vm0, %v384_v11, 0.0 }
  0x40   : > { %v396_v27 = vadd.f32 %v395_v20, %v394_v16  ;;  %v403_v28 = vadd.f32 %v402_v21, %v401_v17  ;;  %v410_v29 = vadd.f32 %v409_v22, %v408_v18  ;;  %v417_v30 = vadd.f32 %v416_v23, %v415_v19 }
  0x41   : > { %v437_v31 = vrot.slane %v436_v24, 4  ;;  %v444_v32 = vrot.slane %v443_v25, 4  ;;  %v451_v33 = vrot.slane %v450_v26, 4  ;;  %v458_v34 = vrot.slane %v457_v1, 4 }
  0x42   : > { %v397_v35 = vrot.slane %v396_v27, 2  ;;  %v404_v36 = vrot.slane %v403_v28, 2  ;;  %v411_v37 = vrot.slane %v410_v29, 2  ;;  %v418_v38 = vrot.slane %v417_v30, 2 }
  0x43   : > { %v438_v39 = vadd.f32 %v437_v31, %v436_v24  ;;  %v445_v40 = vadd.f32 %v444_v32, %v443_v25  ;;  %v452_v41 = vadd.f32 %v451_v33, %v450_v26  ;;  %v459_v42 = vadd.f32 %v458_v34, %v457_v1 }
  0x44   : > { %v398_v43 = vadd.f32 %v397_v35, %v396_v27  ;;  %v405_v44 = vadd.f32 %v404_v36, %v403_v28  ;;  %v412_v45 = vadd.f32 %v411_v37, %v410_v29  ;;  %v419_v46 = vadd.f32 %v418_v38, %v417_v30 }
  0x45   : > { %v439_v47 = vrot.slane %v438_v39, 2  ;;  %v446_v48 = vrot.slane %v445_v40, 2  ;;  %v453_v49 = vrot.slane %v452_v41, 2  ;;  %v460_v50 = vrot.slane %v459_v42, 2 }
  0x46   : > { %v399_v51 = vrot.slane %v398_v43, 1  ;;  %v406_v52 = vrot.slane %v405_v44, 1  ;;  %v413_v53 = vrot.slane %v412_v45, 1  ;;  %v420_v54 = vrot.slane %v419_v46, 1 }
  0x47   : > { %v440_v55 = vadd.f32 %v439_v47, %v438_v39  ;;  %v447_v56 = vadd.f32 %v446_v48, %v445_v40  ;;  %v454_v57 = vadd.f32 %v453_v49, %v452_v41  ;;  %v461_v58 = vadd.f32 %v460_v50, %v459_v42 }
  0x48   : > { %v400_v59 = vadd.f32 %v399_v51, %v398_v43  ;;  %v407_v60 = vadd.f32 %v406_v52, %v405_v44  ;;  %v414_v61 = vadd.f32 %v413_v53, %v412_v45  ;;  %v421_v62 = vadd.f32 %v420_v54, %v419_v46 }
  0x49   : > { %v441_v63 = vrot.slane %v440_v55, 1  ;;  %v448_v0 = vrot.slane %v447_v56, 1  ;;  %v455_v2 = vrot.slane %v454_v57, 1  ;;  %v462_v3 = vrot.slane %v461_v58, 1 }
  0x4a   : > { %v427_v5 = vsel %vm426_vm5, %v407_v60, %v400_v59 }
  0x4b   : > { %v429_v6 = vsel %vm428_vm6, %v414_v61, %v427_v5  ;;  %v442_v7 = vadd.f32 %v441_v63, %v440_v55  ;;  %v449_v8 = vadd.f32 %v448_v0, %v447_v56  ;;  %v456_v9 = vadd.f32 %v455_v2, %v454_v57 }
  0x4c   : > { %v431_v10 = vsel %vm430_vm7, %v421_v62, %v429_v6  ;;  %v463_v11 = vadd.f32 %v462_v3, %v461_v58 }
  0x4d   : > { %v433_v12 = vadd.f32 %v431_v10, %v389_v4  ;;  %v468_v14 = vsel %vm426_vm5, %v449_v8, %v442_v7 }
  0x4e   : > { %v469_v15 = vsel %vm428_vm6, %v456_v9, %v468_v14 }
  0x4f   : > { %434 = vst [vmem:[#allocation2] sm:$0xf] %v433_v12  ;;  %v470_v16 = vsel %vm430_vm7, %v463_v11, %v469_v15 }
  0x50   : > { %v472_v17 = vadd.f32 %v470_v16, %v435_v13 }
  0x52   : > { %473 = vst [vmem:[#allocation3] sm:$0xf] %v472_v17 }
  0x56   : > { %v520_v18 = vld [vmem:[#allocation2] sm:$0xf] }
  0x57   : > { %521 = vst [vmem:[%s326_s7] sm:$0xf] %v520_v18 }
  0x59   : > { %v522_v19 = vld [vmem:[#allocation3] sm:$0xf] }
  0x5a   : > { %523 = vst [vmem:[%s333_s10] sm:$0xf] %v522_v19 }
  0x5b PF: > { %s15_s17 = sadd.s32 1, %s774_s17   ;;  %s910_s15 = smov %s770_s16 }
  0x5c   : > { %p12_p5 = scmp.ge.s32.totalorder %s15_s17, 4   ;;  %s911_s16 = smov %s913_s18 }
  0x5e   :  { %14 = sbr.rel (!%p12_p5) target bundleno = 2 (0x2), region = 93 }

</bundles_post_ra>
